<compile_context>
chip_gen: v7x
topology: tpu7x:2x2x1
jax: 0.10.0
libtpu: 0.0.40
codegen_flags: <defaults>
</compile_context>

<pallas_src>
import functools
import math

import jax
import jax.numpy as jnp
from jax.experimental import pallas as pl
from jax.experimental.pallas import tpu as pltpu


def _sublane_pack(dtype) -> int:
    return max(8, 32 // jnp.dtype(dtype).itemsize)


def _vmem_budget():
    """(max_block_bytes, vmem_limit_bytes) chosen per TPU generation."""
    vmem_cap = 64 * 1024 * 1024  # conservative default (v7x: 64 MiB / TC)
    try:
        vmem_cap = int(pltpu.get_tpu_info().vmem_capacity_bytes)
    except Exception:
        pass
    if vmem_cap >= 96 * 1024 * 1024:          # v5e / v6e: 128 MiB VMEM
        return 16 * 1024 * 1024, 96 * 1024 * 1024
    # v7x: 64 MiB per TC -> keep 4x double-buffered blocks well inside the limit
    return 10 * 1024 * 1024, 48 * 1024 * 1024


def _choose_batches_per_block(B, C, budget_rows, pack):
    """Batches per fused block, or None if one batch's slab does not fit."""
    if C > budget_rows:
        return None
    nb_max = min(B, budget_rows // C)
    aligned = [nb for nb in range(1, nb_max + 1) if (nb * C) % pack == 0]
    # Prefer >= 2 grid steps so the "parallel" axis shards across both v7x
    # TensorCores; among those, take the largest (sublane-aligned) block.
    if B >= 2:
        multi = [nb for nb in aligned if nb <= (B + 1) // 2]
        if multi:
            return max(multi)
    if nb_max == B:
        return B                 # single full-(N, HW) block: always layout-legal
    if aligned:
        return max(aligned)
    return None


def _eca_fused_kernel(w_ref, x_ref, o_ref, *, C):
    # w_ref: SMEM (3,) f32 -- conv taps pre-scaled by 1/HW
    # x_ref: VMEM (R, HW)  -- R = (batches in block) * C rows
    # o_ref: VMEM (R, HW)
    R = x_ref.shape[0]

    # Global average pool over spatial lanes, f32 accumulation.  1/HW is
    # folded into the taps, so a plain sum suffices; Mosaic masks the lanes
    # past the logical extent of the final partial vreg.
    y = jnp.sum(x_ref[...], axis=1, dtype=jnp.float32, keepdims=True)  # (R, 1)

    # Conv1d over channels (k=3, padding=1, no bias) as two sublane rolls plus
    # channel-boundary masks, so it never leaks across batch boundaries.
    cpos = jax.lax.broadcasted_iota(jnp.int32, (R, 1), 0) % C
    y_left = jnp.where(cpos == 0, 0.0, pltpu.roll(y, shift=1, axis=0))
    y_right = jnp.where(cpos == C - 1, 0.0, pltpu.roll(y, shift=R - 1, axis=0))
    conv = w_ref[0] * y_left + w_ref[1] * y + w_ref[2] * y_right

    # Sigmoid gate (EUP), then rescale; the big tile streams from VMEM twice
    # instead of being held live in vregs across the reduce->gate chain.
    gate = jax.nn.sigmoid(conv).astype(o_ref.dtype)      # (R, 1)
    o_ref[...] = x_ref[...] * gate                       # broadcast over lanes


def _pool_kernel(x_ref, s_ref):
    # Per-row spatial sum (rows are independent -> edge-block padding is safe).
    s_ref[...] = jnp.sum(x_ref[...], axis=1, dtype=jnp.float32, keepdims=True)


def _gate_kernel(g_ref, x_ref, o_ref):
    o_ref[...] = x_ref[...] * g_ref[...].astype(o_ref.dtype)


def eca_forward(x, w, *, max_block_bytes=None):
    """ECA forward.  x: (B, C, H, W) NCHW; w: (3,) conv1d taps (no bias)."""
    B, C, H, W = x.shape
    hw = H * W
    N = B * C
    dtype = x.dtype
    itemsize = jnp.dtype(dtype).itemsize
    pack = _sublane_pack(dtype)

    block_cap, vmem_limit = _vmem_budget()
    if max_block_bytes is not None:
        block_cap = max_block_bytes

    xr = x.reshape(N, hw)                                   # free reshape (contiguous)
    w32 = w.astype(jnp.float32) * (1.0 / float(hw))         # fold 1/HW into the taps
    params = pltpu.CompilerParams(
        dimension_semantics=("parallel",),
        vmem_limit_bytes=vmem_limit,
    )

    budget_rows = max(1, block_cap // (hw * itemsize))
    nb = _choose_batches_per_block(B, C, budget_rows, pack)

    if nb is not None:
        # ---- Fused single-pass path: 1 HBM read + 1 HBM write ----
        rows = nb * C
        grid = (pl.cdiv(B, nb),)
        out = pl.pallas_call(
            functools.partial(_eca_fused_kernel, C=C),
            out_shape=jax.ShapeDtypeStruct((N, hw), dtype),
            grid=grid,
            in_specs=[
                pl.BlockSpec(memory_space=pltpu.MemorySpace.SMEM),   # conv taps
                pl.BlockSpec((rows, hw), lambda i: (i, 0)),          # activations
            ],
            out_specs=pl.BlockSpec((rows, hw), lambda i: (i, 0)),
            compiler_params=params,
        )(w32, xr)
        return out.reshape(B, C, H, W)

    # ---- Fallback: one batch's (C, HW) slab exceeds the block budget ----
    # Two streaming passes over x (pool rows, then gate rows); the tiny (B, C)
    # conv + sigmoid between them runs as plain XLA ops.
    tr = (budget_rows // pack) * pack
    if tr == 0:
        tr = pack
    tr = min(tr, N)   # tr is a pack multiple or the full N -> layout-legal
    if tr * hw * itemsize * 4 > vmem_limit:
        # TODO(synk): add an HW-split reduction grid axis for extreme spatial
        # sizes instead of erroring out.
        raise NotImplementedError(
            f"ECA Pallas kernel: a {tr}x{hw} tile (x4 pipeline buffers) exceeds "
            f"the VMEM budget; HW-split reduction path not implemented.")

    grid_rows = (pl.cdiv(N, tr),)
    sums = pl.pallas_call(
        _pool_kernel,
        out_shape=jax.ShapeDtypeStruct((N, 1), jnp.float32),
        grid=grid_rows,
        in_specs=[pl.BlockSpec((tr, hw), lambda i: (i, 0))],
        out_specs=pl.BlockSpec((tr, 1), lambda i: (i, 0)),
        compiler_params=params,
    )(xr)

    # Tiny (B, C) channel conv + sigmoid -- negligible next to the streaming passes.
    y = sums.reshape(B, C) * (1.0 / float(hw))
    yp = jnp.pad(y, ((0, 0), (1, 1)))
    wf = w.astype(jnp.float32)
    conv = wf[0] * yp[:, :-2] + wf[1] * yp[:, 1:-1] + wf[2] * yp[:, 2:]
    gate = jax.nn.sigmoid(conv).reshape(N, 1)

    out = pl.pallas_call(
        _gate_kernel,
        out_shape=jax.ShapeDtypeStruct((N, hw), dtype),
        grid=grid_rows,
        in_specs=[
            pl.BlockSpec((tr, 1), lambda i: (i, 0)),        # per-row gate
            pl.BlockSpec((tr, hw), lambda i: (i, 0)),       # activations
        ],
        out_specs=pl.BlockSpec((tr, hw), lambda i: (i, 0)),
        compiler_params=params,
    )(gate, xr)
    return out.reshape(B, C, H, W)


def eca_reference(x, w):
    """Pure-JAX reference mirroring the PyTorch forward."""
    y = jnp.mean(x, axis=(2, 3))                      # adaptive avg pool -> (B, C)
    yp = jnp.pad(y, ((0, 0), (1, 1)))                 # conv1d padding=1
    conv = w[0] * yp[:, :-2] + w[1] * yp[:, 1:-1] + w[2] * yp[:, 2:]
    gate = jax.nn.sigmoid(conv)
    return x * gate[:, :, None, None]


if __name__ == "__main__":
    key = jax.random.PRNGKey(0)
    kx, kw = jax.random.split(key)

    # Deterministic Conv1d(1, 1, k=3, bias=False) weight init
    # (PyTorch default: U(-1/sqrt(fan_in), 1/sqrt(fan_in)), fan_in = 1*3).
    bound = 1.0 / math.sqrt(3.0)
    w = jax.random.uniform(kw, (3,), minval=-bound, maxval=bound,
                           dtype=jnp.float32)

    # Primary small test (module-consistent shapes), fused single-block path.
    x = jax.random.normal(kx, (2, 4, 16, 16), dtype=jnp.float32)
    out = jax.block_until_ready(eca_forward(x, w))
    assert out.shape == x.shape
    assert jnp.allclose(out, eca_reference(x, w), atol=1e-5, rtol=1e-5)

    # Non-128-aligned spatial size + multi-block grid (masked-tail reduce/store).
    x2 = jax.random.normal(jax.random.PRNGKey(1), (2, 8, 7, 7), dtype=jnp.float32)
    out2 = jax.block_until_ready(eca_forward(x2, w))
    assert jnp.allclose(out2, eca_reference(x2, w), atol=1e-5, rtol=1e-5)

    # Force the large-HW two-pass fallback with a tiny block budget.
    x3 = jax.random.normal(jax.random.PRNGKey(2), (2, 16, 16, 16), dtype=jnp.float32)
    out3 = jax.block_until_ready(eca_forward(x3, w, max_block_bytes=8 * 1024))
    assert jnp.allclose(out3, eca_reference(x3, w), atol=1e-5, rtol=1e-5)

    print("KERNEL_OK")
</pallas_src>

<mosaic_0001>
module attributes {stable_mosaic.version = 11 : i64} {
  func.func @_eca_fused_kernel(%arg0: i32, %arg1: memref<3xf32, #tpu.memory_space<smem>>, %arg2: memref<8x256xf32, #tpu.memory_space<vmem>>, %arg3: memref<8x256xf32, #tpu.memory_space<vmem>>) attributes {dimension_semantics = [#tpu.dimension_semantics<parallel>], iteration_bounds = array<i64: 1>, scalar_prefetch = 0 : i64, scratch_operands = 0 : i64, tpu.core_type = #tpu.core_type<tc>, window_params = [{transform_indices = @transform_0, window_bounds = array<i64: 3>}, {transform_indices = @transform_1, window_bounds = array<i64: 8, 256>}, {transform_indices = @transform_2, window_bounds = array<i64: 8, 256>}]} {
    %c0 = arith.constant 0 : index
    %c0_0 = arith.constant 0 : index
    %0 = vector.load %arg2[%c0, %c0_0] : memref<8x256xf32, #tpu.memory_space<vmem>>, vector<8x256xf32>
    %cst = arith.constant dense<0.000000e+00> : vector<8xf32>
    %1 = vector.multi_reduction <add>, %0, %cst [1] : vector<8x256xf32> to vector<8xf32>
    %2 = vector.shape_cast %1 : vector<8xf32> to vector<8x1xf32>
    %3 = tpu.iota {dimensions = array<i32: 0>} : vector<8x1xi32>
    %c4_i32 = arith.constant 4 : i32
    %c0_i32 = arith.constant 0 : i32
    %4 = arith.cmpi eq, %c4_i32, %c0_i32 : i32
    %c1_i32 = arith.constant 1 : i32
    %5 = arith.select %4, %c1_i32, %c4_i32 : i32
    %6 = vector.broadcast %5 : i32 to vector<8x1xi32>
    %7 = arith.remsi %3, %6 : vector<8x1xi32>
    %c0_i32_1 = arith.constant 0 : i32
    %8 = vector.broadcast %c0_i32_1 : i32 to vector<8x1xi32>
    %9 = arith.cmpi ne, %7, %8 : vector<8x1xi32>
    %c0_i32_2 = arith.constant 0 : i32
    %10 = vector.broadcast %c0_i32_2 : i32 to vector<8x1xi32>
    %11 = arith.cmpi slt, %7, %10 : vector<8x1xi32>
    %c0_i32_3 = arith.constant 0 : i32
    %12 = arith.cmpi slt, %5, %c0_i32_3 : i32
    %13 = vector.broadcast %12 : i1 to vector<8x1xi1>
    %14 = vector.broadcast %13 : vector<8x1xi1> to vector<8x1xi1>
    %15 = arith.xori %11, %14 : vector<8x1xi1>
    %16 = arith.andi %15, %9 : vector<8x1xi1>
    %17 = vector.broadcast %5 : i32 to vector<8x1xi32>
    %18 = arith.addi %7, %17 : vector<8x1xi32>
    %19 = arith.select %16, %18, %7 : vector<8x1xi1>, vector<8x1xi32>
    %c0_i32_4 = arith.constant 0 : i32
    %20 = vector.broadcast %c0_i32_4 : i32 to vector<8x1xi32>
    %21 = arith.cmpi eq, %19, %20 : vector<8x1xi32>
    %c1_i32_5 = arith.constant 1 : i32
    %22 = tpu.dynamic_rotate %2 by %c1_i32_5 dim 0 : vector<8x1xf32>, i32 -> vector<8x1xf32>
    %cst_6 = arith.constant 0.000000e+00 : f32
    %23 = vector.broadcast %cst_6 : f32 to vector<8x1xf32>
    %24 = arith.select %21, %23, %22 : vector<8x1xi1>, vector<8x1xf32>
    %c3_i32 = arith.constant 3 : i32
    %25 = vector.broadcast %c3_i32 : i32 to vector<8x1xi32>
    %26 = arith.cmpi eq, %19, %25 : vector<8x1xi32>
    %c7_i32 = arith.constant 7 : i32
    %27 = tpu.dynamic_rotate %2 by %c7_i32 dim 0 : vector<8x1xf32>, i32 -> vector<8x1xf32>
    %cst_7 = arith.constant 0.000000e+00 : f32
    %28 = vector.broadcast %cst_7 : f32 to vector<8x1xf32>
    %29 = arith.select %26, %28, %27 : vector<8x1xi1>, vector<8x1xf32>
    %c0_8 = arith.constant 0 : index
    %30 = memref.load %arg1[%c0_8] : memref<3xf32, #tpu.memory_space<smem>>
    %31 = vector.broadcast %30 : f32 to vector<8x1xf32>
    %32 = arith.mulf %31, %24 : vector<8x1xf32>
    %c1 = arith.constant 1 : index
    %33 = memref.load %arg1[%c1] : memref<3xf32, #tpu.memory_space<smem>>
    %34 = vector.broadcast %33 : f32 to vector<8x1xf32>
    %35 = arith.mulf %34, %2 : vector<8x1xf32>
    %36 = arith.addf %32, %35 : vector<8x1xf32>
    %c2 = arith.constant 2 : index
    %37 = memref.load %arg1[%c2] : memref<3xf32, #tpu.memory_space<smem>>
    %38 = vector.broadcast %37 : f32 to vector<8x1xf32>
    %39 = arith.mulf %38, %29 : vector<8x1xf32>
    %40 = arith.addf %36, %39 : vector<8x1xf32>
    %41 = arith.negf %40 : vector<8x1xf32>
    %42 = math.exp %41 : vector<8x1xf32>
    %cst_9 = arith.constant 1.000000e+00 : f32
    %43 = vector.broadcast %cst_9 : f32 to vector<8x1xf32>
    %44 = arith.addf %43, %42 : vector<8x1xf32>
    %45 = arith.divf %43, %44 : vector<8x1xf32>
    %c0_10 = arith.constant 0 : index
    %c0_11 = arith.constant 0 : index
    %46 = vector.load %arg2[%c0_10, %c0_11] : memref<8x256xf32, #tpu.memory_space<vmem>>, vector<8x256xf32>
    %47 = vector.broadcast %45 : vector<8x1xf32> to vector<8x256xf32>
    %48 = arith.mulf %46, %47 : vector<8x256xf32>
    %c0_12 = arith.constant 0 : index
    %c0_13 = arith.constant 0 : index
    %49 = vector.load %arg3[%c0_12, %c0_13] : memref<8x256xf32, #tpu.memory_space<vmem>>, vector<8x256xf32>
    tpu.vector_store %arg3[%c0_12, %c0_13], %48 {strides = array<i32>} : memref<8x256xf32, #tpu.memory_space<vmem>>, vector<8x256xf32>,
    return
  }
  func.func @transform_0(%arg0: i32) -> i32 {
    %c0_i32 = arith.constant 0 : i32
    %c0_i32_0 = arith.constant 0 : i32
    return %c0_i32 : i32
  }
  func.func @transform_1(%arg0: i32) -> (i32, i32) {
    %c0_i32 = arith.constant 0 : i32
    %c0_i32_0 = arith.constant 0 : i32
    return %arg0, %c0_i32 : i32, i32
  }
  func.func @transform_2(%arg0: i32) -> (i32, i32) {
    %c0_i32 = arith.constant 0 : i32
    %c0_i32_0 = arith.constant 0 : i32
    return %arg0, %c0_i32 : i32, i32
  }
}

</mosaic_0001>

<bundles_post_ra>
// kernel: tpu_custom_call.1
= control target key start
LH: loop header
LB: loop body
LE: loop exit
PB: predicated region body
PF: predicated region fallthrough
CT: control target
= control target key end

     0   :  { %7 = vsyncpa [#allocation5], 0  ;;  %s229_s0 = inlined_call_operand.hbm [shape: f32[3], index: 0, kind: input, shape index: {}]   ;;  %s230_s1 = inlined_call_operand.hbm [shape: f32[8,256], index: 1, kind: input, shape index: {}]   ;;  %s231_s2 = inlined_call_operand.hbm [shape: f32[8,256], index: 2, kind: output, shape index: {}]  }
   0x1   :  { %8 = vsyncpa [#allocation3], 0 }
   0x2   :  { %9 = vsyncpa [#allocation4], 0  ;;  %s114_s11 = scalar_lea.hbm %s229_s0, 16 }
   0x3   :  { %p115_p0 = scmp.ne.s32.totalorder %s229_s0, %s114_s11  ;;  %p118_p1 = scmp.lt.u32.totalorder %s114_s11, %s229_s0 }
   0x5   :  { %p120_p2 = pnand %p118_p1, %p115_p0 }
   0x7   :  { %123 = shalt.err (!%p120_p2)
}
   0x8   :  { %s174_s16 = smov [#allocation2]   ;;  %s175_s19 = smov [#allocation6]  }
   0x9   :  { %17 = dma.hbm_to_smem %s229_s0, 16, %s174_s16, [#allocation5]  }
   0xa   :  { %s24_s20 = sshll.u32 %s175_s19, 4  ;;  %s124_s23 = scalar_lea.hbm %s230_s1, 256  ;;  %s25_s20 = int_to_ptr.vmem [resolvable:$true] %s24_s20 }
   0xb   :  { %p125_p3 = scmp.ne.s32.totalorder %s230_s1, %s124_s23  ;;  %p128_p4 = scmp.lt.u32.totalorder %s124_s23, %s230_s1 }
   0xd   :  { %p130_p5 = pnand %p128_p4, %p125_p3 }
   0xf   :  { %133 = shalt.err (!%p130_p5)
}
  0x10   :  { %s134_s28 = scalar_lea.vmem %s25_s20, 256  ;;  %p139_p7 = scmp.lt.s32.totalorder %s25_s20, %s25_s20 }
  0x11   :  { %p135_p6 = scmp.ne.s32.totalorder %s25_s20, %s134_s28  ;;  %p140_p8 = scmp.lt.s32.totalorder %s134_s28, %s134_s28 }
  0x13   :  { %p141_p9 = por %p140_p8, %p139_p7 }
  0x15   :  { %p142_p10 = pnand %p141_p9, %p135_p6 }
  0x17   :  { %145 = shalt.err (!%p142_p10)
}
  0x18   :  { %27 = dma.hbm_to_vmem [thread:$0]  %s230_s1, 256, %s25_s20, [#allocation3]  }
  0x19   :  { %168 = dma.done.wait [#allocation5], 16  }
  0x1a   :  { %169 = vsyncadd [#allocation5], 4294967280 }
  0x1b   :  { %170 = dma.done.wait [#allocation3], 256  }
  0x1c   :  { %171 = vsyncadd [#allocation3], 4294967040 }
  0x1d   :  { %34 = sfence }
  0x1e   :  { %v35_v0 = vld [vmem:[#allocation6] sm:$0xff]  ;;  %v36_v1 = vld [vmem:[#allocation6 + $0x8] sm:$0xff]  ;;  %v176_v3 = vmov 0   ;;  %v40_v4 = vlaneseq  ;;  %s60_s30 = sld [smem:[#allocation2]]  ;;  %s102_s3 = sld [smem:[#allocation2 + $0x1]] }
  0x1f   :  { %v37_v2 = vadd.f32 %v36_v1, %v35_v0  ;;  %109 = vset.pattern.permute.xlu0 %v176_v3  ;;  %s103_s4 = sld [smem:[#allocation2 + $0x2]]  ;;  %s177_s1 = smov [#allocation7]  }
  0x20   :  { %v41_v5 = vshrl.u32 %v40_v4, 7  ;;  %s92_s5 = sshll.u32 %s177_s1, 4  ;;  %s93_s5 = int_to_ptr.vmem [resolvable:$true] %s92_s5 }
  0x21   :  { %38 = vadd.xlane.f32.xlu0 %v37_v2  ;;  %s146_s6 = scalar_lea.vmem %s93_s5, 256  ;;  %p151_p12 = scmp.lt.s32.totalorder %s93_s5, %s93_s5 }
  0x22   :  { %v46_v6 = vand.u32 3, %v41_v5  ;;  %p147_p11 = scmp.ne.s32.totalorder %s93_s5, %s146_s6  ;;  %p152_p13 = scmp.lt.s32.totalorder %s146_s6, %s146_s6 }
  0x24   :  { %vm54_vm0 = vcmp.eq.s32.totalorder %v46_v6, 0  ;;  %vm57_vm1 = vcmp.eq.s32.totalorder %v46_v6, 3  ;;  %v61_v8 = vstv %s60_s30  ;;  %v64_v9 = vstv %s102_s3  ;;  %p153_p0 = por %p152_p13, %p151_p12 }
  0x25   :  { %v68_v12 = vstv %s103_s4 }
  0x26   :  { %p154_p1 = pnand %p153_p0, %p147_p11 }
  0xae   :  { %v39_v7 = vpop.xlane.xlu0 %38 }
  0xaf   :  { %v55_v10 = vrot.slane %v39_v7, 7  ;;  %v58_v11 = vrot.slane %v39_v7, 1  ;;  %v65_v16 = vmul.f32 %v64_v9, %v39_v7 }
  0xb1   :  { %v56_v13 = vsel %vm54_vm0, 0.0, %v55_v10  ;;  %v59_v14 = vsel %vm57_vm1, 0.0, %v58_v11 }
  0xb2   :  { %v62_v15 = vmul.f32 %v61_v8, %v56_v13  ;;  %v69_v18 = vmul.f32 %v68_v12, %v59_v14 }
  0xb4   :  { %v66_v17 = vadd.f32 %v65_v16, %v62_v15 }
  0xb6   :  { %v70_v19 = vadd.f32 %v69_v18, %v66_v17 }
  0xb8   :  { %v104_v20 = vmul.f32 -1.442695, %v70_v19 }
  0xba   :  { %110 = vpow2.f32 %v104_v20 }
  0xc4   :  { %v111_v21 = vpop.eup %110 }
  0xc5   :  { %v74_v22 = vadd.f32 1.0, %v111_v21 }
  0xc7   :  { %112 = vrcp.f32 %v74_v22 }
  0xd1   :  { %v113_v23 = vpop.eup %112 }
  0xd2   :  { %79 = vperm.xlu0 %109, %v113_v23  }
 0x151   :  { %v80_v24 = vpop.permute.xlu0 %79 }
 0x152   :  { %v82_v25 = vmul.f32 %v80_v24, %v35_v0  ;;  %v83_v26 = vmul.f32 %v80_v24, %v36_v1 }
 0x154   :  { %84 = vst [vmem:[#allocation7] sm:$0xff] %v82_v25  ;;  %85 = vst [vmem:[#allocation7 + $0x8] sm:$0xff] %v83_v26 }
 0x155   :  { %157 = shalt.err (!%p154_p1)
}
 0x156   :  { %s158_s9 = scalar_lea.hbm %s231_s2, 256 }
 0x157   :  { %p159_p2 = scmp.ne.s32.totalorder %s231_s2, %s158_s9  ;;  %p162_p3 = scmp.lt.u32.totalorder %s158_s9, %s231_s2 }
 0x159   :  { %p164_p4 = pnand %p162_p3, %p159_p2 }
 0x15b   :  { %167 = shalt.err (!%p164_p4)
}
 0x15c   :  { %95 = dma.vmem_to_hbm [thread:$0]  %s93_s5, 256, %s231_s2, [#allocation4]  }
 0x15d   :  { %172 = dma.done.wait [#allocation4], 256  }
 0x15e   :  { %173 = vsyncadd [#allocation4], 4294967040 }
 0x15f   :  { %99 = vsyncpa [#allocation3], 1 }
 0x160   :  { %100 = vsyncpa [#allocation4], 1 }
 0x161   :  { %101 = vsyncpa [#allocation5], 1 }

</bundles_post_ra>
